<compile_context>
chip_gen: v5e
topology: v5e:2x2
jax: 0.10.0
libtpu: 0.0.40
codegen_flags: <defaults>
</compile_context>

<pallas_src>
import jax
import jax.numpy as jnp
from jax.experimental import pallas as pl
from jax.experimental.pallas import tpu as pltpu

HIDDEN = 64   # true hidden width of the PyTorch module
LANE = 128    # TPU lane width -> padded hidden width


def _round_up(x, m):
    return (x + m - 1) // m * m


def _choose_tiling(batch, cap=2048):
    """Pick (padded_batch, tile_b). Single tile when the batch fits under `cap`,
    otherwise an even number of <=cap tiles (balances v7x's 2 TensorCores)."""
    b = max(int(batch), 1)
    if b <= cap:
        tile_b = _round_up(b, 8)
        return tile_b, tile_b
    steps = -(-b // cap)            # ceil
    if steps % 2:
        steps += 1                  # even step count for v7x megacore sharding
    tile_b = _round_up(-(-b // steps), 8)
    return steps * tile_b, tile_b


def dqn_kernel(x_ref, w1_ref, b1_ref, w2_ref, b2_ref, w3_ref, b3_ref, o_ref):
    # In-kernel bf16 cast of the activations; all matmuls accumulate in f32 on the MXU,
    # bias-add + ReLU stay f32 on the VPU (v5e-safe).
    x = x_ref[...].astype(jnp.bfloat16)
    h = jnp.dot(x, w1_ref[...], preferred_element_type=jnp.float32)          # fc1
    h = jnp.maximum(h + b1_ref[...], 0.0)
    h = jnp.dot(h.astype(jnp.bfloat16), w2_ref[...],
                preferred_element_type=jnp.float32)                          # fc2
    h = jnp.maximum(h + b2_ref[...], 0.0)
    o = jnp.dot(h.astype(jnp.bfloat16), w3_ref[...],
                preferred_element_type=jnp.float32)                          # fc5
    o = o + b3_ref[...]
    out_cols = o_ref.shape[-1]
    # Store only the real output columns (padded weight/bias columns are zero anyway).
    o_ref[...] = o[:, :out_cols].astype(o_ref.dtype)


def init_params(key, input_dim, output_dim, hidden=HIDDEN):
    # Deterministic init mimicking PyTorch nn.Linear default (uniform +/- 1/sqrt(fan_in)).
    def linear(key, fan_in, fan_out):
        kw, kb = jax.random.split(key)
        bound = 1.0 / jnp.sqrt(jnp.float32(fan_in))
        w = jax.random.uniform(kw, (fan_in, fan_out), jnp.float32, -bound, bound)
        b = jax.random.uniform(kb, (1, fan_out), jnp.float32, -bound, bound)
        return w, b

    k1, k2, k3 = jax.random.split(key, 3)
    w1, b1 = linear(k1, input_dim, hidden)
    w2, b2 = linear(k2, hidden, hidden)
    w3, b3 = linear(k3, hidden, output_dim)
    return (w1, b1, w2, b2, w3, b3)


def pad_params(params):
    """Zero-pad hidden/output lane dims to 128; weights -> bf16, biases stay f32."""
    w1, b1, w2, b2, w3, b3 = params
    in_dim, hidden = w1.shape
    out_dim = w3.shape[1]
    h_pad = _round_up(hidden, LANE)
    o_pad = _round_up(out_dim, LANE)

    def pad2(a, rows, cols):
        return jnp.zeros((rows, cols), a.dtype).at[:a.shape[0], :a.shape[1]].set(a)

    w1p = pad2(w1, in_dim, h_pad).astype(jnp.bfloat16)
    b1p = pad2(b1, 1, h_pad)
    w2p = pad2(w2, h_pad, h_pad).astype(jnp.bfloat16)
    b2p = pad2(b2, 1, h_pad)
    w3p = pad2(w3, h_pad, o_pad).astype(jnp.bfloat16)
    b3p = pad2(b3, 1, o_pad)
    return (w1p, b1p, w2p, b2p, w3p, b3p), out_dim


def dqn_forward(x, padded_params, out_dim, *, tile_cap=2048):
    """x: (B, input_dim) f32. padded_params from pad_params(). Returns (B, out_dim) f32."""
    w1, b1, w2, b2, w3, b3 = padded_params
    B, in_dim = x.shape
    k_dim = w1.shape[0]          # input feature dim
    h_pad = w2.shape[0]          # 128
    o_pad = w3.shape[1]          # 128
    assert in_dim == k_dim

    b_pad, tile_b = _choose_tiling(B, tile_cap)
    if b_pad != B:
        # Only pad the ragged batch tail (no feature pad, no dtype cast in the wrapper).
        x = jnp.pad(x, ((0, b_pad - B), (0, 0)))
    grid = (b_pad // tile_b,)

    flops = 2 * b_pad * (k_dim * h_pad + h_pad * h_pad + h_pad * o_pad)
    bytes_accessed = (
        b_pad * k_dim * 4                              # x read (f32)
        + (w1.size + w2.size + w3.size) * 2            # bf16 weights
        + (b1.size + b2.size + b3.size) * 4            # f32 biases
        + b_pad * out_dim * 4)                         # real output columns only

    const = lambda i: (0, 0)
    out = pl.pallas_call(
        dqn_kernel,
        out_shape=jax.ShapeDtypeStruct((b_pad, out_dim), jnp.float32),
        grid=grid,
        in_specs=[
            pl.BlockSpec((tile_b, k_dim), lambda i: (i, 0)),  # x tile (batch-tiled, f32)
            pl.BlockSpec((k_dim, h_pad), const),              # w1 (VMEM-resident)
            pl.BlockSpec((1, h_pad), const),                  # b1
            pl.BlockSpec((h_pad, h_pad), const),              # w2
            pl.BlockSpec((1, h_pad), const),                  # b2
            pl.BlockSpec((h_pad, o_pad), const),              # w3
            pl.BlockSpec((1, o_pad), const),                  # b3
        ],
        out_specs=pl.BlockSpec((tile_b, out_dim), lambda i: (i, 0)),
        compiler_params=pltpu.CompilerParams(
            dimension_semantics=("parallel",)),
        cost_estimate=pl.CostEstimate(
            flops=flops, transcendentals=0, bytes_accessed=bytes_accessed),
    )(x, w1, b1, w2, b2, w3, b3)

    return out[:B] if b_pad != B else out


def dqn_reference(x, padded_params, out_dim):
    # Same numerics as the kernel: bf16 operands, f32 accumulation, f32 bias/ReLU.
    w1, b1, w2, b2, w3, b3 = padded_params
    f32 = jnp.float32
    h = x.astype(jnp.bfloat16)
    h = jnp.maximum(jnp.dot(h, w1, preferred_element_type=f32) + b1, 0.0)
    h = jnp.maximum(jnp.dot(h.astype(jnp.bfloat16), w2, preferred_element_type=f32) + b2, 0.0)
    o = jnp.dot(h.astype(jnp.bfloat16), w3, preferred_element_type=f32) + b3
    return o[:, :out_dim]


if __name__ == "__main__":
    key = jax.random.PRNGKey(0)
    kx, kp = jax.random.split(key)

    batch, input_dim, output_dim = 8, 16, 4
    x = jax.random.normal(kx, (batch, input_dim), jnp.float32)
    params = init_params(kp, input_dim, output_dim)
    padded_params, out_dim = pad_params(params)

    out = dqn_forward(x, padded_params, out_dim)
    out = jax.block_until_ready(out)

    ref = dqn_reference(x, padded_params, out_dim)
    assert out.shape == (batch, output_dim)
    assert jnp.allclose(out, ref, atol=2e-2, rtol=2e-2), "mismatch vs reference"

    print("KERNEL_OK")
</pallas_src>

<mosaic_0001>
module attributes {stable_mosaic.version = 11 : i64} {
  func.func @dqn_kernel(%arg0: i32, %arg1: memref<8x16xf32, #tpu.memory_space<vmem>>, %arg2: memref<16x128xbf16, #tpu.memory_space<vmem>>, %arg3: memref<1x128xf32, #tpu.memory_space<vmem>>, %arg4: memref<128x128xbf16, #tpu.memory_space<vmem>>, %arg5: memref<1x128xf32, #tpu.memory_space<vmem>>, %arg6: memref<128x128xbf16, #tpu.memory_space<vmem>>, %arg7: memref<1x128xf32, #tpu.memory_space<vmem>>, %arg8: memref<8x4xf32, #tpu.memory_space<vmem>>) attributes {dimension_semantics = [#tpu.dimension_semantics<parallel>], iteration_bounds = array<i64: 1>, scalar_prefetch = 0 : i64, scratch_operands = 0 : i64, tpu.core_type = #tpu.core_type<tc>, window_params = [{transform_indices = @transform_0, window_bounds = array<i64: 8, 16>}, {pipeline_mode = #tpu.pipeline_mode<synchronous>, transform_indices = @transform_1, window_bounds = array<i64: 16, 128>}, {pipeline_mode = #tpu.pipeline_mode<synchronous>, transform_indices = @transform_2, window_bounds = array<i64: 1, 128>}, {pipeline_mode = #tpu.pipeline_mode<synchronous>, transform_indices = @transform_3, window_bounds = array<i64: 128, 128>}, {pipeline_mode = #tpu.pipeline_mode<synchronous>, transform_indices = @transform_4, window_bounds = array<i64: 1, 128>}, {pipeline_mode = #tpu.pipeline_mode<synchronous>, transform_indices = @transform_5, window_bounds = array<i64: 128, 128>}, {pipeline_mode = #tpu.pipeline_mode<synchronous>, transform_indices = @transform_6, window_bounds = array<i64: 1, 128>}, {transform_indices = @transform_7, window_bounds = array<i64: 8, 4>}]} {
    %c0 = arith.constant 0 : index
    %c0_0 = arith.constant 0 : index
    %0 = vector.load %arg1[%c0, %c0_0] : memref<8x16xf32, #tpu.memory_space<vmem>>, vector<8x16xf32>
    %1 = arith.truncf %0 : vector<8x16xf32> to vector<8x16xbf16>
    %c0_1 = arith.constant 0 : index
    %c0_2 = arith.constant 0 : index
    %2 = vector.load %arg2[%c0_1, %c0_2] : memref<16x128xbf16, #tpu.memory_space<vmem>>, vector<16x128xbf16>
    %cst = arith.constant dense<0.000000e+00> : vector<8x128xf32>
    %3 = tpu.matmul %1, %2, %cst {dimension_numbers = #tpu.dot_dimension_numbers<[1], [0], [0], [1], [0, 0, 1, 1], [], []>} : vector<8x16xbf16>, vector<16x128xbf16>, vector<8x128xf32> -> vector<8x128xf32>
    %c0_3 = arith.constant 0 : index
    %c0_4 = arith.constant 0 : index
    %4 = vector.load %arg3[%c0_3, %c0_4] : memref<1x128xf32, #tpu.memory_space<vmem>>, vector<1x128xf32>
    %5 = vector.broadcast %4 : vector<1x128xf32> to vector<8x128xf32>
    %6 = arith.addf %3, %5 : vector<8x128xf32>
    %cst_5 = arith.constant 0.000000e+00 : f32
    %7 = vector.broadcast %cst_5 : f32 to vector<8x128xf32>
    %8 = arith.maximumf %6, %7 : vector<8x128xf32>
    %9 = arith.truncf %8 : vector<8x128xf32> to vector<8x128xbf16>
    %c0_6 = arith.constant 0 : index
    %c0_7 = arith.constant 0 : index
    %10 = vector.load %arg4[%c0_6, %c0_7] : memref<128x128xbf16, #tpu.memory_space<vmem>>, vector<128x128xbf16>
    %cst_8 = arith.constant dense<0.000000e+00> : vector<8x128xf32>
    %11 = tpu.matmul %9, %10, %cst_8 {dimension_numbers = #tpu.dot_dimension_numbers<[1], [0], [0], [1], [0, 0, 1, 1], [], []>} : vector<8x128xbf16>, vector<128x128xbf16>, vector<8x128xf32> -> vector<8x128xf32>
    %c0_9 = arith.constant 0 : index
    %c0_10 = arith.constant 0 : index
    %12 = vector.load %arg5[%c0_9, %c0_10] : memref<1x128xf32, #tpu.memory_space<vmem>>, vector<1x128xf32>
    %13 = vector.broadcast %12 : vector<1x128xf32> to vector<8x128xf32>
    %14 = arith.addf %11, %13 : vector<8x128xf32>
    %cst_11 = arith.constant 0.000000e+00 : f32
    %15 = vector.broadcast %cst_11 : f32 to vector<8x128xf32>
    %16 = arith.maximumf %14, %15 : vector<8x128xf32>
    %17 = arith.truncf %16 : vector<8x128xf32> to vector<8x128xbf16>
    %c0_12 = arith.constant 0 : index
    %c0_13 = arith.constant 0 : index
    %18 = vector.load %arg6[%c0_12, %c0_13] : memref<128x128xbf16, #tpu.memory_space<vmem>>, vector<128x128xbf16>
    %cst_14 = arith.constant dense<0.000000e+00> : vector<8x128xf32>
    %19 = tpu.matmul %17, %18, %cst_14 {dimension_numbers = #tpu.dot_dimension_numbers<[1], [0], [0], [1], [0, 0, 1, 1], [], []>} : vector<8x128xbf16>, vector<128x128xbf16>, vector<8x128xf32> -> vector<8x128xf32>
    %c0_15 = arith.constant 0 : index
    %c0_16 = arith.constant 0 : index
    %20 = vector.load %arg7[%c0_15, %c0_16] : memref<1x128xf32, #tpu.memory_space<vmem>>, vector<1x128xf32>
    %21 = vector.broadcast %20 : vector<1x128xf32> to vector<8x128xf32>
    %22 = arith.addf %19, %21 : vector<8x128xf32>
    %23 = vector.extract_strided_slice %22 {offsets = [0, 0], sizes = [8, 4], strides = [1, 1]} : vector<8x128xf32> to vector<8x4xf32>
    %c0_17 = arith.constant 0 : index
    %c0_18 = arith.constant 0 : index
    %24 = vector.load %arg8[%c0_17, %c0_18] : memref<8x4xf32, #tpu.memory_space<vmem>>, vector<8x4xf32>
    tpu.vector_store %arg8[%c0_17, %c0_18], %23 {strides = array<i32>} : memref<8x4xf32, #tpu.memory_space<vmem>>, vector<8x4xf32>,
    return
  }
  func.func @transform_0(%arg0: i32) -> (i32, i32) {
    %c0_i32 = arith.constant 0 : i32
    %c0_i32_0 = arith.constant 0 : i32
    return %arg0, %c0_i32 : i32, i32
  }
  func.func @transform_1(%arg0: i32) -> (i32, i32) {
    %c0_i32 = arith.constant 0 : i32
    %c0_i32_0 = arith.constant 0 : i32
    %c0_i32_1 = arith.constant 0 : i32
    return %c0_i32, %c0_i32_0 : i32, i32
  }
  func.func @transform_2(%arg0: i32) -> (i32, i32) {
    %c0_i32 = arith.constant 0 : i32
    %c0_i32_0 = arith.constant 0 : i32
    %c0_i32_1 = arith.constant 0 : i32
    return %c0_i32, %c0_i32_0 : i32, i32
  }
  func.func @transform_3(%arg0: i32) -> (i32, i32) {
    %c0_i32 = arith.constant 0 : i32
    %c0_i32_0 = arith.constant 0 : i32
    %c0_i32_1 = arith.constant 0 : i32
    return %c0_i32, %c0_i32_0 : i32, i32
  }
  func.func @transform_4(%arg0: i32) -> (i32, i32) {
    %c0_i32 = arith.constant 0 : i32
    %c0_i32_0 = arith.constant 0 : i32
    %c0_i32_1 = arith.constant 0 : i32
    return %c0_i32, %c0_i32_0 : i32, i32
  }
  func.func @transform_5(%arg0: i32) -> (i32, i32) {
    %c0_i32 = arith.constant 0 : i32
    %c0_i32_0 = arith.constant 0 : i32
    %c0_i32_1 = arith.constant 0 : i32
    return %c0_i32, %c0_i32_0 : i32, i32
  }
  func.func @transform_6(%arg0: i32) -> (i32, i32) {
    %c0_i32 = arith.constant 0 : i32
    %c0_i32_0 = arith.constant 0 : i32
    %c0_i32_1 = arith.constant 0 : i32
    return %c0_i32, %c0_i32_0 : i32, i32
  }
  func.func @transform_7(%arg0: i32) -> (i32, i32) {
    %c0_i32 = arith.constant 0 : i32
    %c0_i32_0 = arith.constant 0 : i32
    return %arg0, %c0_i32 : i32, i32
  }
}

</mosaic_0001>

<bundles_post_ra>
// kernel: tpu_custom_call.1
= control target key start
LH: loop header
LB: loop body
LE: loop exit
PB: predicated region body
PF: predicated region fallthrough
CT: control target
= control target key end

     0   :  { %12 = vsyncpa [#allocation3], 0  ;;  %s561_s0 = inlined_call_operand.hbm [shape: f32[8,16], index: 0, kind: input, shape index: {}]   ;;  %s562_s1 = inlined_call_operand.hbm [shape: bf16[16,128], index: 1, kind: input, shape index: {}]   ;;  %s563_s2 = inlined_call_operand.vmem [shape: f32[1,128], index: 2, kind: input, shape index: {}]   ;;  %s564_s3 = inlined_call_operand.hbm [shape: bf16[128,128], index: 3, kind: input, shape index: {}]   ;;  %s565_s4 = inlined_call_operand.vmem [shape: f32[1,128], index: 4, kind: input, shape index: {}]   ;;  %s566_s5 = inlined_call_operand.hbm [shape: bf16[128,128], index: 5, kind: input, shape index: {}]   ;;  %s567_s6 = inlined_call_operand.vmem [shape: f32[1,128], index: 6, kind: input, shape index: {}]   ;;  %s568_s7 = inlined_call_operand.vmem [shape: f32[8,4], index: 7, kind: output, shape index: {}]  }
   0x1   :  { %13 = vsyncpa [#allocation5], 0  ;;  %s30_s26 = sshll.u32 %s562_s1, 4  ;;  %s31_s26 = int_to_ptr.hbm [resolvable:$true] %s30_s26 }
   0x2   :  { %14 = vsyncpa [#allocation8], 0  ;;  %s491_s27 = smov [#allocation4]   ;;  %s20_s8 = sshll.u32 %s561_s0, 4  ;;  %s21_s8 = int_to_ptr.hbm [resolvable:$true] %s20_s8 }
   0x3   :  { %s32_s28 = sshll.u32 %s491_s27, 4  ;;  %s492_s9 = smov 64   ;;  %s33_s28 = int_to_ptr.vmem [resolvable:$true] %s32_s28 }
   0x4   :  { %s493_s10 = smov 4   ;;  %s494_s11 = smov [#allocation2]  }
   0x5   :  { %38 = dma.hbm_to_vmem [thread:$0]  %s31_s26, 128, %s33_s28, [#allocation5], %s492_s9, %s492_s9, %s493_s10  }
   0x6   :  { %s22_s12 = sshll.u32 %s494_s11, 4  ;;  %s45_s15 = sshll.u32 %s564_s3, 4  ;;  %s23_s12 = int_to_ptr.vmem [resolvable:$true] %s22_s12  ;;  %s46_s15 = int_to_ptr.hbm [resolvable:$true] %s45_s15 }
   0x7   :  { %25 = dma.hbm_to_vmem [thread:$0]  %s21_s8, 128, %s23_s12, [#allocation3]  }
   0x8   :  { %s60_s17 = sshll.u32 %s566_s5, 4  ;;  %s495_s18 = smov [#allocation6]   ;;  %s61_s17 = int_to_ptr.hbm [resolvable:$true] %s60_s17 }
   0x9   :  { %s47_s19 = sshll.u32 %s495_s18, 4  ;;  %s496_s0 = smov [#allocation7]   ;;  %s48_s19 = int_to_ptr.vmem [resolvable:$true] %s47_s19 }
   0xa   :  { %53 = dma.hbm_to_vmem [thread:$0]  %s46_s15, 1024, %s48_s19, [#allocation5], %s492_s9, %s492_s9, %s493_s10  }
   0xb   :  { %s62_s20 = sshll.u32 %s496_s0, 4  ;;  %s63_s20 = int_to_ptr.vmem [resolvable:$true] %s62_s20 }
   0xc   :  { %68 = dma.hbm_to_vmem [thread:$0]  %s61_s17, 1024, %s63_s20, [#allocation8], %s492_s9, %s492_s9, %s493_s10  }
   0xd   :  { %485 = dma.done.wait [#allocation3], 128  }
   0xe   :  { %486 = vsyncadd [#allocation3], 4294967168 }
   0xf   :  { %487 = dma.done.wait [#allocation5], 1152  }
  0x10   :  { %488 = vsyncadd [#allocation5], 4294966144 }
  0x11   :  { %489 = dma.done.wait [#allocation8], 1024  }
  0x12   :  { %490 = vsyncadd [#allocation8], 4294966272  ;;  %v363_v0 = vld [vmem:[#allocation4] sm:$0xff]  ;;  %v88_v1 = vld [vmem:[#allocation2] sm:$0xff]  ;;  %vm102_vm0 = vcmask 130048   ;;  %vm285_vm1 = vcmask 31744  }
  0x13   :  { %v371_v2 = vld [vmem:[#allocation6 + $0x38] sm:$0xff]  ;;  %v89_v3 = vpack.c.bf16 %v88_v1, %v88_v1  ;;  %113 = vmatpush.bf16.msra.mxu0 %v363_v0  ;;  %v370_v4 = vld [vmem:[#allocation6 + $0x30] sm:$0xff]  ;;  %v369_v5 = vld [vmem:[#allocation6 + $0x28] sm:$0xff] }
  0x14   :  { %189 = vmatpush.bf16.msra.mxu1 %v371_v2  ;;  %v368_v6 = vld [vmem:[#allocation6 + $0x20] sm:$0xff]  ;;  %v367_v7 = vld [vmem:[#allocation6 + $0x18] sm:$0xff]  ;;  %v366_v8 = vld [vmem:[#allocation6 + $0x10] sm:$0xff] }
  0x15   :  { %v365_v9 = vld [vmem:[#allocation6 + $0x8] sm:$0xff]  ;;  %v364_v10 = vld [vmem:[#allocation6] sm:$0xff]  ;;  %v379_v11 = vld [vmem:[#allocation7 + $0x38] sm:$0xff] }
  0x16   :  { %298 = vmatmul.msk.bf16.vlgmr.msra.gmra.mxu0 %vm102_vm0, %v89_v3  ;;  %272 = vmatpush.bf16.msra.mxu2 %v379_v11  ;;  %v378_v12 = vld [vmem:[#allocation7 + $0x30] sm:$0xff]  ;;  %v377_v13 = vld [vmem:[#allocation7 + $0x28] sm:$0xff]  ;;  %v376_v14 = vld [vmem:[#allocation7 + $0x20] sm:$0xff] }
  0x17   :  { %v375_v15 = vld [vmem:[#allocation7 + $0x18] sm:$0xff]  ;;  %v374_v16 = vld [vmem:[#allocation7 + $0x10] sm:$0xff]  ;;  %v373_v23 = vld [vmem:[#allocation7 + $0x8] sm:$0xff] }
  0x18   :  { %190 = vmatpush.bf16.msra.mxu1 %v370_v4  ;;  %v386_v17 = vld [vmem:[%s563_s2] ss:$0 sm:$0xff]  ;;  %v372_v24 = vld [vmem:[#allocation7] sm:$0xff] }
  0x19   :  { %v387_v25 = vld [vmem:[%s565_s4] ss:$0 sm:$0xff] }
  0x1a   :  { %273 = vmatpush.bf16.msra.mxu2 %v378_v12  ;;  %v388_v31 = vld [vmem:[%s567_s6] ss:$0 sm:$0xff] }
  0x1c   :  { %191 = vmatpush.bf16.msra.mxu1 %v369_v5 }
  0x1e   :  { %274 = vmatpush.bf16.msra.mxu2 %v377_v13 }
  0x20   :  { %192 = vmatpush.bf16.msra.mxu1 %v368_v6 }
  0x22   :  { %275 = vmatpush.bf16.msra.mxu2 %v376_v14 }
  0x24   :  { %193 = vmatpush.bf16.msra.mxu1 %v367_v7 }
  0x26   :  { %276 = vmatpush.bf16.msra.mxu2 %v375_v15 }
  0x28   :  { %194 = vmatpush.bf16.msra.mxu1 %v366_v8 }
  0x2a   :  { %277 = vmatpush.bf16.msra.mxu2 %v374_v16 }
  0x2c   :  { %195 = vmatpush.bf16.msra.mxu1 %v365_v9 }
  0x2e   :  { %278 = vmatpush.bf16.msra.mxu2 %v373_v23 }
  0x30   :  { %196 = vmatpush.bf16.msra.mxu1 %v364_v10 }
  0x32   :  { %279 = vmatpush.bf16.msra.mxu2 %v372_v24 }
  0x93   :  { %v115_v18 = vpop.f32.mrf.mxu0 }
  0x94   :  { %v116_v19 = vadd.f32 %v386_v17, %v115_v18 }
  0x96   :  { %v119_v20 = vmax.f32 %v116_v19, 0.0 }
  0x98   :  { %v120_v21 = vpack.c.bf16 %v119_v20, %v119_v20 }
  0x9a   :  { %197 = vmatmul.bf16.vlgmr.msra.gmra.mxu1 %v120_v21 }
  0x9b   :  { %v117_v22 = vpop.f32.mrf.mxu0 }
 0x117   :  { %v198_v26 = vpop.f32.mrf.mxu1 }
 0x118   :  { %v199_v27 = vadd.f32 %v387_v25, %v198_v26 }
 0x11a   :  { %v202_v28 = vmax.f32 %v199_v27, 0.0 }
 0x11c   :  { %v203_v29 = vpack.c.bf16 %v202_v28, %v202_v28 }
 0x11e   :  { %280 = vmatmul.bf16.vlgmr.msra.gmra.mxu2 %v203_v29 }
 0x11f   :  { %v200_v30 = vpop.f32.mrf.mxu1 }
 0x1a1   :  { %v281_v32 = vpop.f32.mrf.mxu2 }
 0x1a2   :  { %v282_v33 = vadd.f32 %v388_v31, %v281_v32 }
 0x1a4   :  { %286 = vst.msk [vmem:[%s568_s7] sm:$0xff] %vm285_vm1, %v282_v33 }
 0x1a9   :  { %v283_v34 = vpop.f32.mrf.mxu2 }
 0x1aa   :  { %291 = vsyncpa [#allocation3], 1 }
 0x1ab   :  { %292 = vsyncpa [#allocation5], 1 }
 0x1ac   :  { %293 = vsyncpa [#allocation8], 1 }

</bundles_post_ra>
